<compile_context>
chip_gen: v7x
topology: tpu7x:2x2x1
jax: 0.10.0
libtpu: 0.0.40
codegen_flags: <defaults>
</compile_context>

<pallas_src>
import math

import jax
import jax.numpy as jnp
import numpy as np
from jax.experimental import pallas as pl
from jax.experimental.pallas import tpu as pltpu

_MIB = 2 ** 20
_CONV_VMEM_BUDGET = 40 * _MIB   # per-step tile budget (v7x 64 MiB with headroom)
_POOL_VMEM_BUDGET = 24 * _MIB
_TARGET_M = 512                 # target MXU M rows per conv tile


# --------------------------------------------------------------------------
# small helpers
# --------------------------------------------------------------------------
def _round_up(x, m):
    return ((x + m - 1) // m) * m


def _cdiv(a, b):
    return -(-a // b)


def _lane_pad(c):
    # Pad a channel dim to a multiple of 128 only when the extra HBM traffic is
    # <= ~33% (e.g. 320 -> 384).  Tiny channel counts stay unpadded.
    cp = _round_up(c, 128)
    return cp if cp * 3 <= c * 4 else c


def _pick_cout_tile(coutp):
    if coutp <= 512:
        return coutp
    for tn in (512, 384, 256, 128):   # coutp > 512 is always a multiple of 128
        if coutp % tn == 0:
            return tn
    return coutp


def _conv_vmem_terms(wp, cinp, tn, xbytes, wbytes):
    # Per-grid-step VMEM footprint, split into TH-independent and per-output-row
    # terms.  Double buffering (x2) is counted for everything pipelined.
    fixed = (2 * 9 * cinp * tn * wbytes       # weight block
             + 2 * 4 * wp * cinp * xbytes     # halo-row block
             + 2 * tn * 4)                    # bias block
    per_row = (2 * 4 * wp * cinp * xbytes     # main input block
               + 2 * wp * tn * xbytes         # output block
               + wp * tn * 4                  # f32 accumulator scratch
               + 3 * wp * cinp * 4)           # transient per-tap operands
    return fixed, per_row


# --------------------------------------------------------------------------
# Kernels
# --------------------------------------------------------------------------
def _avgpool2x2_kernel(x_ref, o_ref):
    # x_ref: (TA, 2, Wo, 2*C) -- dim 1 = row parity, last dim = [d=0 ch | d=1 ch]
    # o_ref: (TA, Wo, C)
    c = o_ref.shape[-1]
    r0 = x_ref[:, 0]
    r1 = x_ref[:, 1]
    a = r0[..., :c].astype(jnp.float32)
    b = r0[..., c:].astype(jnp.float32)
    cc = r1[..., :c].astype(jnp.float32)
    d = r1[..., c:].astype(jnp.float32)
    o_ref[...] = (((a + b) + (cc + d)) * 0.25).astype(o_ref.dtype)


# taps ordered k = kh*3 + kw: (k, parity plane p=2*rh+rw, row offset qh, col shift qw)
_TAPS = (
    (0, 0, 0, 0), (1, 1, 0, 0), (2, 0, 0, 1),
    (3, 2, 0, 0), (4, 3, 0, 0), (5, 2, 0, 1),
    (6, 0, 1, 0), (7, 1, 1, 0), (8, 0, 1, 1),
)


def _make_conv3x3_s2_kernel(compute_dtype):
    def kernel(main_ref, halo_ref, w_ref, b_ref, o_ref, acc_ref):
        # main_ref: (4, TH, Wp, Cin)   parity planes, TH rows of this row tile
        # halo_ref: (4, 1,  Wp, Cin)   the single halo row below the tile
        # w_ref:    (9*Cin, TN)        taps flattened as (kh*3+kw)*Cin + cin
        # b_ref:    (1, TN)            f32 bias slice
        # o_ref:    (1, TH*Wp, TN)
        # acc_ref:  (TH*Wp, TN)        f32 accumulator scratch
        _, th, wp, cin = main_ref.shape
        m = th * wp

        def prep(x):                       # (rows, Wp, Cin) -> (rows*Wp, Cin)
            if compute_dtype is not None:
                x = x.astype(compute_dtype)
            return x.reshape(-1, cin)

        def shift_cols(x):
            # column +1 tap: shift left by one; the wrapped column lands only in
            # output column Wp-1 >= Wo, which the wrapper discards.
            return jnp.roll(x, shift=-1, axis=-2)

        def wtap(k):
            return w_ref[k * cin:(k + 1) * cin, :]

        first = True
        for k, p, qh, qw in _TAPS:
            if qh == 0:
                x = main_ref[p]                                  # (TH, Wp, Cin)
                if qw:
                    x = shift_cols(x)
                contrib = jnp.dot(prep(x), wtap(k),
                                  preferred_element_type=jnp.float32)
                if first:
                    acc_ref[...] = contrib
                    first = False
                else:
                    acc_ref[...] += contrib
            else:
                # row-offset-1 taps: rows 1..TH-1 of the main block feed output
                # rows 0..TH-2; the halo row feeds output row TH-1.
                if th > 1:
                    x = main_ref[p, 1:th]                        # (TH-1, Wp, Cin)
                    if qw:
                        x = shift_cols(x)
                    acc_ref[0:(th - 1) * wp, :] += jnp.dot(
                        prep(x), wtap(k), preferred_element_type=jnp.float32)
                xh = halo_ref[p]                                 # (1, Wp, Cin)
                if qw:
                    xh = shift_cols(xh)
                acc_ref[(th - 1) * wp:m, :] += jnp.dot(
                    prep(xh), wtap(k), preferred_element_type=jnp.float32)

        o_ref[0] = (acc_ref[...] + b_ref[...].astype(jnp.float32)
                    ).astype(o_ref.dtype)
    return kernel


# --------------------------------------------------------------------------
# pallas_call wrappers (NHWC in, NHWC out)
# --------------------------------------------------------------------------
def avg_pool_2x2(x_nhwc):
    N, H, W, C = x_nhwc.shape
    Ho, Wo = H // 2, W // 2                      # floor, matches F.avg_pool2d(2,2)
    x = x_nhwc[:, :2 * Ho, :2 * Wo, :]
    # Pure contiguous-dims reshape -> no transpose, no extra HBM pass.
    M = N * Ho
    st = x.reshape(M, 2, Wo, 2 * C)

    xbytes = jnp.dtype(x.dtype).itemsize
    per_row = (2 * 2 * Wo * 2 * C * xbytes       # input rows, double-buffered
               + 2 * Wo * C * xbytes             # output rows, double-buffered
               + 5 * Wo * C * 4)                 # f32 temporaries
    TA = int(max(1, min(M, _POOL_VMEM_BUDGET // per_row)))
    if TA >= 8:
        TA = (TA // 8) * 8
    vmem_limit = int(min(56 * _MIB, max(32 * _MIB, TA * per_row + 8 * _MIB)))

    y = pl.pallas_call(
        _avgpool2x2_kernel,
        out_shape=jax.ShapeDtypeStruct((M, Wo, C), x.dtype),
        grid=(_cdiv(M, TA),),
        in_specs=[pl.BlockSpec((TA, 2, Wo, 2 * C), lambda i: (i, 0, 0, 0))],
        out_specs=pl.BlockSpec((TA, Wo, C), lambda i: (i, 0, 0)),
        compiler_params=pltpu.CompilerParams(
            dimension_semantics=("parallel",),
            vmem_limit_bytes=vmem_limit),
    )(st)
    return y.reshape(N, Ho, Wo, C)


def conv3x3_stride2(x_nhwc, w_oihw, bias, compute_dtype=jnp.bfloat16):
    # Implements F.pad(x, (0,1,0,1)) followed by Conv2d(k=3, stride=2, pad=0).
    N, H, W, C = x_nhwc.shape
    Cout, Cin = w_oihw.shape[0], w_oihw.shape[1]
    assert Cin == C
    Ho = (H - 2) // 2 + 1
    Wo = (W - 2) // 2 + 1

    Cinp = _round_up(C, 128)                 # lane-aligned per-tap K
    Coutp = _lane_pad(Cout)                  # lane-dense stores when cheap
    Wp = _round_up(Wo + 1, 8)                # full parity-plane width incl. col halo

    xbytes = jnp.dtype(x_nhwc.dtype).itemsize
    wdtype = compute_dtype if compute_dtype is not None else w_oihw.dtype
    wbytes = jnp.dtype(wdtype).itemsize

    TN = _pick_cout_tile(Coutp)
    n_ct = Coutp // TN

    # ---- pick TH from an honest double-buffered VMEM budget
    fixed, per_row = _conv_vmem_terms(Wp, Cinp, TN, xbytes, wbytes)
    avail = _CONV_VMEM_BUDGET - fixed
    th_budget = max(1, avail // per_row) if avail > 0 else 1
    th_target = max(1, _TARGET_M // Wp)
    TH = int(max(1, min(Ho, th_budget, th_target)))
    # v7x has 2 TensorCores: keep >= ~4 parallel grid steps so both cores get
    # work and each still pipelines; prefer more tiles over a bigger TH.
    while N * _cdiv(Ho, TH) * n_ct < 4 and TH > 1:
        TH = _cdiv(TH, 2)
    T = _cdiv(Ho, TH)
    R = T * TH + 1
    vmem_limit = int(min(56 * _MIB, max(32 * _MIB, fixed + TH * per_row + 8 * _MIB)))

    # ---- stage input: zero-pad (covers the module's F.pad), parity-split planes
    xp = jnp.pad(x_nhwc, ((0, 0), (0, 2 * R - H), (0, 2 * Wp - W), (0, Cinp - C)))
    st = xp.reshape(N, R, 2, Wp, 2, Cinp).transpose(0, 2, 4, 1, 3, 5)
    st = st.reshape(N * 4, R, Wp, Cinp)      # plane index p = 2*row_par + col_par

    # ---- weights: OIHW -> (9*Cinp, Coutp), taps ordered kh*3+kw, cin innermost
    wpad = jnp.pad(w_oihw, ((0, Coutp - Cout), (0, Cinp - C), (0, 0), (0, 0)))
    wk = jnp.transpose(wpad, (2, 3, 1, 0)).reshape(9 * Cinp, Coutp).astype(wdtype)
    bk = jnp.pad(bias, (0, Coutp - Cout)).astype(jnp.float32).reshape(1, Coutp)

    kernel = _make_conv3x3_s2_kernel(compute_dtype)
    y = pl.pallas_call(
        kernel,
        out_shape=jax.ShapeDtypeStruct((N * T, TH * Wp, Coutp), x_nhwc.dtype),
        grid=(N, T, n_ct),
        in_specs=[
            # main row tile (4 parity planes, TH rows)
            pl.BlockSpec((4, TH, Wp, Cinp), lambda b, t, n: (b, t, 0, 0)),
            # 1-row halo below the tile, fetched from the same staged array
            pl.BlockSpec((4, 1, Wp, Cinp), lambda b, t, n: (b, t * TH + TH, 0, 0)),
            # Cout-tiled weight / bias slices
            pl.BlockSpec((9 * Cinp, TN), lambda b, t, n: (0, n)),
            pl.BlockSpec((1, TN), lambda b, t, n: (0, n)),
        ],
        out_specs=pl.BlockSpec((1, TH * Wp, TN), lambda b, t, n: (b * T + t, 0, n)),
        scratch_shapes=[pltpu.VMEM((TH * Wp, TN), jnp.float32)],
        compiler_params=pltpu.CompilerParams(
            dimension_semantics=("parallel", "parallel", "parallel"),
            vmem_limit_bytes=vmem_limit),
    )(st, st, wk, bk)

    y = y.reshape(N, T * TH, Wp, Coutp)[:, :Ho, :Wo, :Cout]
    return y


# --------------------------------------------------------------------------
# Module-equivalent wrapper (parameters built deterministically in-script)
# --------------------------------------------------------------------------
class DownSampleBlock:
    def __init__(self, inplanes, use_conv=False, key=None,
                 compute_dtype=jnp.bfloat16):
        self.use_conv = use_conv
        self.inplanes = inplanes
        self.compute_dtype = compute_dtype
        if self.use_conv:
            if key is None:
                key = jax.random.PRNGKey(0)
            kw_key, kb_key = jax.random.split(key)
            fan_in = inplanes * 3 * 3
            bound = 1.0 / math.sqrt(fan_in)
            # PyTorch OIHW weight layout, default Conv2d init
            self.weight = jax.random.uniform(kw_key, (inplanes, inplanes, 3, 3),
                                             jnp.float32, -bound, bound)
            self.bias = jax.random.uniform(kb_key, (inplanes,),
                                           jnp.float32, -bound, bound)

    def __call__(self, x_nchw):
        x = jnp.transpose(x_nchw, (0, 2, 3, 1))          # NCHW -> NHWC (layout glue)
        if self.use_conv:
            y = conv3x3_stride2(x, self.weight, self.bias,
                                compute_dtype=self.compute_dtype)
        else:
            y = avg_pool_2x2(x)
        return jnp.transpose(y, (0, 3, 1, 2))            # NHWC -> NCHW


# --------------------------------------------------------------------------
# Pure-JAX reference (for correctness check only)
# --------------------------------------------------------------------------
def ref_forward(x_nchw, block: DownSampleBlock):
    if block.use_conv:
        xp = jnp.pad(x_nchw, ((0, 0), (0, 0), (0, 1), (0, 1)))
        y = jax.lax.conv_general_dilated(
            xp, block.weight, window_strides=(2, 2), padding="VALID",
            dimension_numbers=("NCHW", "OIHW", "NCHW"),
            precision=jax.lax.Precision.HIGHEST)
        return y + block.bias[None, :, None, None]
    Ho, Wo = x_nchw.shape[2] // 2, x_nchw.shape[3] // 2
    xc = x_nchw[:, :, :2 * Ho, :2 * Wo]
    return (xc[:, :, 0::2, 0::2] + xc[:, :, 0::2, 1::2] +
            xc[:, :, 1::2, 0::2] + xc[:, :, 1::2, 1::2]) * 0.25


# --------------------------------------------------------------------------
if __name__ == "__main__":
    key = jax.random.PRNGKey(0)
    x_key, p_key = jax.random.split(key)

    # PyTorch-convention NCHW input: batch=2, channels=4, spatial=16x16
    x = jax.random.normal(x_key, (2, 4, 16, 16), dtype=jnp.float32)

    # Path 1: default avg-pool downsample
    blk_pool = DownSampleBlock(inplanes=4, use_conv=False)
    y_pool = jax.block_until_ready(blk_pool(x))
    assert y_pool.shape == (2, 4, 8, 8)
    np.testing.assert_allclose(np.asarray(y_pool),
                               np.asarray(ref_forward(x, blk_pool)),
                               rtol=1e-5, atol=1e-5)

    # Path 2a: strided-conv downsample, f32 MXU mode (tight indexing check)
    blk_conv = DownSampleBlock(inplanes=4, use_conv=True, key=p_key,
                               compute_dtype=None)
    y_conv = jax.block_until_ready(blk_conv(x))
    assert y_conv.shape == (2, 4, 8, 8)
    np.testing.assert_allclose(np.asarray(y_conv),
                               np.asarray(ref_forward(x, blk_conv)),
                               rtol=1e-3, atol=1e-4)

    # Path 2b: default fast mode (bf16 operands, f32 accumulate on the MXU)
    blk_conv_fast = DownSampleBlock(inplanes=4, use_conv=True, key=p_key)
    y_fast = jax.block_until_ready(blk_conv_fast(x))
    assert y_fast.shape == (2, 4, 8, 8)
    np.testing.assert_allclose(np.asarray(y_fast),
                               np.asarray(ref_forward(x, blk_conv_fast)),
                               rtol=3e-2, atol=3e-2)

    print("KERNEL_OK")
</pallas_src>

<mosaic_0001>
module attributes {stable_mosaic.version = 11 : i64} {
  func.func @_avgpool2x2_kernel(%arg0: i32, %arg1: memref<16x2x8x8xf32, #tpu.memory_space<vmem>>, %arg2: memref<16x8x4xf32, #tpu.memory_space<vmem>>) attributes {dimension_semantics = [#tpu.dimension_semantics<parallel>], iteration_bounds = array<i64: 1>, scalar_prefetch = 0 : i64, scratch_operands = 0 : i64, tpu.core_type = #tpu.core_type<tc>, window_params = [{transform_indices = @transform_0, window_bounds = array<i64: 16, 2, 8, 8>}, {transform_indices = @transform_1, window_bounds = array<i64: 16, 8, 4>}]} {
    %c0 = arith.constant 0 : index
    %c0_0 = arith.constant 0 : index
    %c0_1 = arith.constant 0 : index
    %c0_2 = arith.constant 0 : index
    %0 = vector.load %arg1[%c0, %c0_0, %c0_1, %c0_2] : memref<16x2x8x8xf32, #tpu.memory_space<vmem>>, vector<16x1x8x8xf32>
    %1 = vector.shape_cast %0 : vector<16x1x8x8xf32> to vector<16x8x8xf32>
    %c0_3 = arith.constant 0 : index
    %c1 = arith.constant 1 : index
    %c0_4 = arith.constant 0 : index
    %c0_5 = arith.constant 0 : index
    %2 = vector.load %arg1[%c0_3, %c1, %c0_4, %c0_5] : memref<16x2x8x8xf32, #tpu.memory_space<vmem>>, vector<16x1x8x8xf32>
    %3 = vector.shape_cast %2 : vector<16x1x8x8xf32> to vector<16x8x8xf32>
    %4 = vector.extract_strided_slice %1 {offsets = [0, 0, 0], sizes = [16, 8, 4], strides = [1, 1, 1]} : vector<16x8x8xf32> to vector<16x8x4xf32>
    %5 = vector.extract_strided_slice %1 {offsets = [0, 0, 4], sizes = [16, 8, 4], strides = [1, 1, 1]} : vector<16x8x8xf32> to vector<16x8x4xf32>
    %6 = vector.extract_strided_slice %3 {offsets = [0, 0, 0], sizes = [16, 8, 4], strides = [1, 1, 1]} : vector<16x8x8xf32> to vector<16x8x4xf32>
    %7 = vector.extract_strided_slice %3 {offsets = [0, 0, 4], sizes = [16, 8, 4], strides = [1, 1, 1]} : vector<16x8x8xf32> to vector<16x8x4xf32>
    %8 = arith.addf %4, %5 : vector<16x8x4xf32>
    %9 = arith.addf %6, %7 : vector<16x8x4xf32>
    %10 = arith.addf %8, %9 : vector<16x8x4xf32>
    %cst = arith.constant 2.500000e-01 : f32
    %11 = vector.broadcast %cst : f32 to vector<16x8x4xf32>
    %12 = arith.mulf %10, %11 : vector<16x8x4xf32>
    %c0_6 = arith.constant 0 : index
    %c0_7 = arith.constant 0 : index
    %c0_8 = arith.constant 0 : index
    %13 = vector.load %arg2[%c0_6, %c0_7, %c0_8] : memref<16x8x4xf32, #tpu.memory_space<vmem>>, vector<16x8x4xf32>
    tpu.vector_store %arg2[%c0_6, %c0_7, %c0_8], %12 {strides = array<i32>} : memref<16x8x4xf32, #tpu.memory_space<vmem>>, vector<16x8x4xf32>,
    return
  }
  func.func @transform_0(%arg0: i32) -> (i32, i32, i32, i32) {
    %c0_i32 = arith.constant 0 : i32
    %c0_i32_0 = arith.constant 0 : i32
    %c0_i32_1 = arith.constant 0 : i32
    %c0_i32_2 = arith.constant 0 : i32
    return %arg0, %c0_i32, %c0_i32_0, %c0_i32_1 : i32, i32, i32, i32
  }
  func.func @transform_1(%arg0: i32) -> (i32, i32, i32) {
    %c0_i32 = arith.constant 0 : i32
    %c0_i32_0 = arith.constant 0 : i32
    %c0_i32_1 = arith.constant 0 : i32
    return %arg0, %c0_i32, %c0_i32_0 : i32, i32, i32
  }
}

</mosaic_0001>

<bundles_post_ra>
// kernel: tpu_custom_call.1
= control target key start
LH: loop header
LB: loop body
LE: loop exit
PB: predicated region body
PF: predicated region fallthrough
CT: control target
= control target key end

     0   :  { %s271_s10 = smov 124   ;;  %vm233_vm0 = vcmask 31744   ;;  %s604_s0 = inlined_call_operand.vmem [shape: f32[16,2,8,8], index: 0, kind: input, shape index: {}]   ;;  %s605_s1 = inlined_call_operand.vmem [shape: f32[16,8,4], index: 1, kind: output, shape index: {}]  }
   0x1   :  { %v285_v0 = vld [vmem:[%s604_s0 + $0x20] sm:$0xff]  ;;  %v299_v2 = vld [vmem:[%s604_s0 + $0x30] sm:$0xff]  ;;  %v255_v16 = vld [vmem:[%s604_s0 + $0x18] sm:$0xff] }
   0x2   :  { %v290_v1 = vld [vmem:[%s604_s0] sm:$0xff]  ;;  %61 = vrot.lane.b32.xlu1 %v285_v0, %s271_s10  ;;  %v304_v3 = vld [vmem:[%s604_s0 + $0x10] sm:$0xff]  ;;  %v254_v17 = vld [vmem:[%s604_s0 + $0x8] sm:$0xff] }
   0x3   :  { %57 = vrot.lane.b32.xlu0 %v290_v1, %s271_s10  ;;  %v313_v4 = vld [vmem:[%s604_s0 + $0x50] sm:$0xff]  ;;  %v318_v5 = vld [vmem:[%s604_s0 + $0x40] sm:$0xff]  ;;  %v257_v18 = vld [vmem:[%s604_s0 + $0x38] sm:$0xff] }
   0x4   :  { %v327_v6 = vld [vmem:[%s604_s0 + $0x70] sm:$0xff]  ;;  %v332_v7 = vld [vmem:[%s604_s0 + $0x60] sm:$0xff]  ;;  %v256_v19 = vld [vmem:[%s604_s0 + $0x28] sm:$0xff] }
   0x5   :  { %v341_v8 = vld [vmem:[%s604_s0 + $0x90] sm:$0xff]  ;;  %v346_v9 = vld [vmem:[%s604_s0 + $0x80] sm:$0xff]  ;;  %v413_v20 = vld [vmem:[%s604_s0 + $0x58] sm:$0xff] }
   0x6   :  { %63 = vrot.lane.b32.xlu1 %v299_v2, %s271_s10  ;;  %v355_v10 = vld [vmem:[%s604_s0 + $0xb0] sm:$0xff]  ;;  %v360_v11 = vld [vmem:[%s604_s0 + $0xa0] sm:$0xff]  ;;  %v418_v21 = vld [vmem:[%s604_s0 + $0x48] sm:$0xff] }
   0x7   :  { %59 = vrot.lane.b32.xlu0 %v304_v3, %s271_s10  ;;  %v369_v12 = vld [vmem:[%s604_s0 + $0xd0] sm:$0xff]  ;;  %v374_v13 = vld [vmem:[%s604_s0 + $0xc0] sm:$0xff]  ;;  %v427_v22 = vld [vmem:[%s604_s0 + $0x78] sm:$0xff] }
   0x8   :  { %v383_v14 = vld [vmem:[%s604_s0 + $0xf0] sm:$0xff]  ;;  %v388_v15 = vld [vmem:[%s604_s0 + $0xe0] sm:$0xff]  ;;  %v432_v23 = vld [vmem:[%s604_s0 + $0x68] sm:$0xff] }
   0x9   :  { %v441_v24 = vld [vmem:[%s604_s0 + $0x98] sm:$0xff]  ;;  %v446_v25 = vld [vmem:[%s604_s0 + $0x88] sm:$0xff] }
   0xa   :  { %67 = vrot.lane.b32.xlu1 %v313_v4, %s271_s10  ;;  %v455_v26 = vld [vmem:[%s604_s0 + $0xb8] sm:$0xff]  ;;  %v460_v27 = vld [vmem:[%s604_s0 + $0xa8] sm:$0xff] }
   0xb   :  { %65 = vrot.lane.b32.xlu0 %v318_v5, %s271_s10  ;;  %v469_v28 = vld [vmem:[%s604_s0 + $0xd8] sm:$0xff]  ;;  %v474_v29 = vld [vmem:[%s604_s0 + $0xc8] sm:$0xff] }
   0xc   :  { %v483_v30 = vld [vmem:[%s604_s0 + $0xf8] sm:$0xff]  ;;  %v488_v31 = vld [vmem:[%s604_s0 + $0xe8] sm:$0xff] }
   0xe   :  { %71 = vrot.lane.b32.xlu1 %v327_v6, %s271_s10 }
   0xf   :  { %69 = vrot.lane.b32.xlu0 %v332_v7, %s271_s10 }
  0x12   :  { %75 = vrot.lane.b32.xlu1 %v341_v8, %s271_s10 }
  0x13   :  { %73 = vrot.lane.b32.xlu0 %v346_v9, %s271_s10 }
  0x16   :  { %79 = vrot.lane.b32.xlu1 %v355_v10, %s271_s10 }
  0x17   :  { %77 = vrot.lane.b32.xlu0 %v360_v11, %s271_s10 }
  0x1a   :  { %83 = vrot.lane.b32.xlu1 %v369_v12, %s271_s10 }
  0x1b   :  { %81 = vrot.lane.b32.xlu0 %v374_v13, %s271_s10 }
  0x1e   :  { %87 = vrot.lane.b32.xlu1 %v383_v14, %s271_s10 }
  0x1f   :  { %85 = vrot.lane.b32.xlu0 %v388_v15, %s271_s10 }
  0x22   :  { %139 = vrot.lane.b32.xlu1 %v255_v16, %s271_s10 }
  0x23   :  { %137 = vrot.lane.b32.xlu0 %v254_v17, %s271_s10 }
  0x26   :  { %143 = vrot.lane.b32.xlu1 %v257_v18, %s271_s10 }
  0x27   :  { %141 = vrot.lane.b32.xlu0 %v256_v19, %s271_s10 }
  0x2a   :  { %147 = vrot.lane.b32.xlu1 %v413_v20, %s271_s10 }
  0x2b   :  { %145 = vrot.lane.b32.xlu0 %v418_v21, %s271_s10 }
  0x2e   :  { %151 = vrot.lane.b32.xlu1 %v427_v22, %s271_s10 }
  0x2f   :  { %149 = vrot.lane.b32.xlu0 %v432_v23, %s271_s10 }
  0x32   :  { %155 = vrot.lane.b32.xlu1 %v441_v24, %s271_s10 }
  0x33   :  { %153 = vrot.lane.b32.xlu0 %v446_v25, %s271_s10 }
  0x36   :  { %159 = vrot.lane.b32.xlu1 %v455_v26, %s271_s10 }
  0x37   :  { %157 = vrot.lane.b32.xlu0 %v460_v27, %s271_s10 }
  0x3a   :  { %163 = vrot.lane.b32.xlu1 %v469_v28, %s271_s10 }
  0x3b   :  { %161 = vrot.lane.b32.xlu0 %v474_v29, %s271_s10 }
  0x3e   :  { %167 = vrot.lane.b32.xlu1 %v483_v30, %s271_s10 }
  0x3f   :  { %165 = vrot.lane.b32.xlu0 %v488_v31, %s271_s10 }
  0x74   :  { %v62_v32 = vpop.permute.xlu1 %61 }
  0x75   :  { %v58_v33 = vpop.permute.xlu0 %57  ;;  %v107_v56 = vadd.f32 %v62_v32, %v285_v0 }
  0x76   :  { %v105_v50 = vadd.f32 %v58_v33, %v290_v1 }
  0x78   :  { %v64_v34 = vpop.permute.xlu1 %63 }
  0x79   :  { %v60_v35 = vpop.permute.xlu0 %59  ;;  %v108_v57 = vadd.f32 %v64_v34, %v299_v2 }
  0x7a   :  { %v106_v51 = vadd.f32 %v60_v35, %v304_v3 }
  0x7c   :  { %v68_v36 = vpop.permute.xlu1 %67 }
  0x7d   :  { %v66_v37 = vpop.permute.xlu0 %65  ;;  %v110_v2 = vadd.f32 %v68_v36, %v313_v4 }
  0x7e   :  { %v109_v3 = vadd.f32 %v66_v37, %v318_v5 }
  0x80   :  { %v72_v38 = vpop.permute.xlu1 %71 }
  0x81   :  { %v70_v39 = vpop.permute.xlu0 %69  ;;  %v112_v34 = vadd.f32 %v72_v38, %v327_v6 }
  0x82   :  { %v111_v35 = vadd.f32 %v70_v39, %v332_v7 }
  0x84   :  { %v76_v40 = vpop.permute.xlu1 %75 }
  0x85   :  { %v74_v41 = vpop.permute.xlu0 %73  ;;  %v114_v38 = vadd.f32 %v76_v40, %v341_v8 }
  0x86   :  { %v113_v39 = vadd.f32 %v74_v41, %v346_v9 }
  0x88   :  { %v494_v42 = vpop.permute.xlu1 %79 }
  0x89   :  { %v496_v43 = vpop.permute.xlu0 %77  ;;  %v116_v40 = vadd.f32 %v494_v42, %v355_v10 }
  0x8c   :  { %v498_v44 = vpop.permute.xlu1 %83 }
  0x8d   :  { %v500_v45 = vpop.permute.xlu0 %81  ;;  %v118_v42 = vadd.f32 %v498_v44, %v369_v12 }
  0x90   :  { %v502_v46 = vpop.permute.xlu1 %87 }
  0x91   :  { %v504_v47 = vpop.permute.xlu0 %85  ;;  %v120_v44 = vadd.f32 %v502_v46, %v383_v14 }
  0x94   :  { %v140_v48 = vpop.permute.xlu1 %139 }
  0x95   :  { %v138_v49 = vpop.permute.xlu0 %137  ;;  %v186_v52 = vadd.f32 %v255_v16, %v140_v48 }
  0x96   :  { %v185_v53 = vadd.f32 %v254_v17, %v138_v49 }
  0x97   :  { %v202_v54 = vadd.f32 %v186_v52, %v106_v51 }
  0x98   :  { %v201_v55 = vadd.f32 %v185_v53, %v105_v50  ;;  %v144_v58 = vpop.permute.xlu1 %143 }
  0x99   :  { %v142_v59 = vpop.permute.xlu0 %141  ;;  %v218_v60 = vmul.f32 0.25, %v202_v54  ;;  %v188_v62 = vadd.f32 %v257_v18, %v144_v58 }
  0x9a   :  { %v217_v61 = vmul.f32 0.25, %v201_v55  ;;  %v187_v63 = vadd.f32 %v256_v19, %v142_v59 }
  0x9b   :  { %235 = vst.msk [vmem:[%s605_s1 + $0x8] sm:$0xff] %vm233_vm0, %v218_v60  ;;  %v204_v0 = vadd.f32 %v188_v62, %v108_v57 }
  0x9c   :  { %234 = vst.msk [vmem:[%s605_s1] sm:$0xff] %vm233_vm0, %v217_v61  ;;  %v203_v1 = vadd.f32 %v187_v63, %v107_v56  ;;  %v148_v16 = vpop.permute.xlu1 %147 }
  0x9d   :  { %v146_v17 = vpop.permute.xlu0 %145  ;;  %v220_v18 = vmul.f32 0.25, %v204_v0  ;;  %v190_v32 = vadd.f32 %v413_v20, %v148_v16 }
  0x9e   :  { %v219_v19 = vmul.f32 0.25, %v203_v1  ;;  %v189_v33 = vadd.f32 %v418_v21, %v146_v17 }
  0x9f   :  { %237 = vst.msk [vmem:[%s605_s1 + $0x18] sm:$0xff] %vm233_vm0, %v220_v18  ;;  %v206_v4 = vadd.f32 %v190_v32, %v110_v2 }
  0xa0   :  { %236 = vst.msk [vmem:[%s605_s1 + $0x10] sm:$0xff] %vm233_vm0, %v219_v19  ;;  %v205_v5 = vadd.f32 %v189_v33, %v109_v3  ;;  %v152_v36 = vpop.permute.xlu1 %151 }
  0xa1   :  { %v150_v20 = vpop.permute.xlu0 %149  ;;  %v222_v37 = vmul.f32 0.25, %v206_v4  ;;  %v192_v48 = vadd.f32 %v427_v22, %v152_v36 }
  0xa2   :  { %v221_v21 = vmul.f32 0.25, %v205_v5  ;;  %v191_v49 = vadd.f32 %v432_v23, %v150_v20 }
  0xa3   :  { %239 = vst.msk [vmem:[%s605_s1 + $0x28] sm:$0xff] %vm233_vm0, %v222_v37  ;;  %v208_v6 = vadd.f32 %v192_v48, %v112_v34 }
  0xa4   :  { %238 = vst.msk [vmem:[%s605_s1 + $0x20] sm:$0xff] %vm233_vm0, %v221_v21  ;;  %v207_v7 = vadd.f32 %v191_v49, %v111_v35  ;;  %v156_v50 = vpop.permute.xlu1 %155 }
  0xa5   :  { %v154_v22 = vpop.permute.xlu0 %153  ;;  %v224_v51 = vmul.f32 0.25, %v208_v6  ;;  %v194_v52 = vadd.f32 %v441_v24, %v156_v50  ;;  %v115_v24 = vadd.f32 %v496_v43, %v360_v11 }
  0xa6   :  { %v223_v23 = vmul.f32 0.25, %v207_v7  ;;  %v193_v53 = vadd.f32 %v446_v25, %v154_v22 }
  0xa7   :  { %241 = vst.msk [vmem:[%s605_s1 + $0x38] sm:$0xff] %vm233_vm0, %v224_v51  ;;  %v210_v8 = vadd.f32 %v194_v52, %v114_v38 }
  0xa8   :  { %240 = vst.msk [vmem:[%s605_s1 + $0x30] sm:$0xff] %vm233_vm0, %v223_v23  ;;  %v209_v9 = vadd.f32 %v193_v53, %v113_v39  ;;  %v160_v41 = vpop.permute.xlu1 %159 }
  0xa9   :  { %v158_v25 = vpop.permute.xlu0 %157  ;;  %v226_v54 = vmul.f32 0.25, %v210_v8  ;;  %v196_v56 = vadd.f32 %v455_v26, %v160_v41  ;;  %v117_v26 = vadd.f32 %v500_v45, %v374_v13 }
  0xaa   :  { %v225_v55 = vmul.f32 0.25, %v209_v9  ;;  %v195_v57 = vadd.f32 %v460_v27, %v158_v25 }
  0xab   :  { %243 = vst.msk [vmem:[%s605_s1 + $0x48] sm:$0xff] %vm233_vm0, %v226_v54  ;;  %v212_v10 = vadd.f32 %v196_v56, %v116_v40 }
  0xac   :  { %242 = vst.msk [vmem:[%s605_s1 + $0x40] sm:$0xff] %vm233_vm0, %v225_v55  ;;  %v211_v11 = vadd.f32 %v195_v57, %v115_v24  ;;  %v164_v43 = vpop.permute.xlu1 %163 }
  0xad   :  { %v162_v27 = vpop.permute.xlu0 %161  ;;  %v228_v58 = vmul.f32 0.25, %v212_v10  ;;  %v198_v60 = vadd.f32 %v469_v28, %v164_v43  ;;  %v119_v28 = vadd.f32 %v504_v47, %v388_v15 }
  0xae   :  { %v227_v59 = vmul.f32 0.25, %v211_v11  ;;  %v197_v61 = vadd.f32 %v474_v29, %v162_v27 }
  0xaf   :  { %245 = vst.msk [vmem:[%s605_s1 + $0x58] sm:$0xff] %vm233_vm0, %v228_v58  ;;  %v214_v12 = vadd.f32 %v198_v60, %v118_v42 }
  0xb0   :  { %244 = vst.msk [vmem:[%s605_s1 + $0x50] sm:$0xff] %vm233_vm0, %v227_v59  ;;  %v213_v13 = vadd.f32 %v197_v61, %v117_v26  ;;  %v168_v45 = vpop.permute.xlu1 %167 }
  0xb1   :  { %v166_v29 = vpop.permute.xlu0 %165  ;;  %v230_v62 = vmul.f32 0.25, %v214_v12  ;;  %v200_v0 = vadd.f32 %v483_v30, %v168_v45 }
  0xb2   :  { %v229_v63 = vmul.f32 0.25, %v213_v13  ;;  %v199_v1 = vadd.f32 %v488_v31, %v166_v29 }
  0xb3   :  { %247 = vst.msk [vmem:[%s605_s1 + $0x68] sm:$0xff] %vm233_vm0, %v230_v62  ;;  %v216_v14 = vadd.f32 %v200_v0, %v120_v44 }
  0xb4   :  { %246 = vst.msk [vmem:[%s605_s1 + $0x60] sm:$0xff] %vm233_vm0, %v229_v63  ;;  %v215_v15 = vadd.f32 %v199_v1, %v119_v28 }
  0xb5   :  { %v232_v46 = vmul.f32 0.25, %v216_v14 }
  0xb6   :  { %v231_v47 = vmul.f32 0.25, %v215_v15 }
  0xb7   :  { %249 = vst.msk [vmem:[%s605_s1 + $0x78] sm:$0xff] %vm233_vm0, %v232_v46 }
  0xb8   :  { %248 = vst.msk [vmem:[%s605_s1 + $0x70] sm:$0xff] %vm233_vm0, %v231_v47 }

</bundles_post_ra>
